<compile_context>
chip_gen: v5e
topology: v5e:2x2
jax: 0.10.0
libtpu: 0.0.40
codegen_flags: <defaults>
</compile_context>

<pallas_src>
import functools

import jax
import jax.numpy as jnp
import numpy as np
from jax.experimental import pallas as pl
from jax.experimental.pallas import tpu as pltpu


def _round_up(x, m):
    return (x + m - 1) // m * m


def _pack_gate_weight(w, h, h_pad):
    """PyTorch (3H, H) GRU weight -> (H_pad, 3*H_pad), each gate lane-aligned.

    Result W satisfies (x @ W)[:, g*H_pad + j] == (x @ w[g*H:(g+1)*H].T)[:, j]
    for j < H, and 0 on all padded columns/rows.
    """
    w3 = w.reshape(3, h, h)                     # [gate, out, in]
    w3 = jnp.transpose(w3, (2, 0, 1))           # [in, gate, out]
    w3 = jnp.pad(w3, ((0, h_pad - h), (0, 0), (0, h_pad - h)))
    return w3.reshape(h_pad, 3 * h_pad)


def _pack_gate_bias(b, h, h_pad):
    b3 = jnp.pad(b.reshape(3, h), ((0, 0), (0, h_pad - h)))
    return b3.reshape(1, 3 * h_pad)


def gru_fused_kernel(x_ref, wi_ref, wh_ref, bi_ref, bh_ref, h_out_ref,
                     gi_scratch, h_scratch, *, t_real, ts, unroll, mask_tail):
    """Fused input-projection + serial GRU recurrence over one time slab.

    x_ref:      (Ts, Bb, Hp)   bf16 embedded inputs for this slab (time-major)
    wi_ref:     (Hp, 3Hp)      bf16 packed W_ih^T (gate blocks lane-aligned)
    wh_ref:     (Hp, 3Hp)      bf16 packed W_hh^T
    bi_ref:     (1, 3Hp)       f32 packed b_ih
    bh_ref:     (1, 3Hp)       f32 packed b_hh
    h_out_ref:  (Bb, Hp)       f32 final hidden state (written once, last slab)
    gi_scratch: (Ts, Bb, 3Hp)  f32 slab of input-gate pre-activations
    h_scratch:  (Bb, Hp)       f32 hidden-state carry across slabs
    """
    t_idx = pl.program_id(1)
    nt = pl.num_programs(1)
    b_block, h_pad = h_out_ref.shape
    h3 = 3 * h_pad

    @pl.when(t_idx == 0)
    def _():
        h_scratch[...] = jnp.zeros_like(h_scratch)

    # Batched input projection for the whole slab: one bf16 MXU matmul,
    # f32 accumulation, bias broadcast added once per slab.
    x_slab = x_ref[...].reshape(ts * b_block, h_pad)            # bf16
    gi = jnp.dot(x_slab, wi_ref[...], preferred_element_type=jnp.float32)
    gi = gi + bi_ref[...]
    gi_scratch[...] = gi.reshape(ts, b_block, h3)

    wh = wh_ref[...]                                            # bf16, resident
    # Hoisted broadcast (JAX does not CSE broadcast_in_dim inside the loop).
    bh_b = jnp.broadcast_to(bh_ref[...], (b_block, h3))

    # TODO(synk): optional micro-opt — pin W_hh in MXU staging registers across
    # timesteps via pltpu.matmul_push_rhs / matmul_acc_lhs / matmul_pop.
    def step(s, h):
        gi_s = gi_scratch[s]                                    # (Bb, 3Hp) f32
        gh = jnp.dot(h.astype(jnp.bfloat16), wh,
                     preferred_element_type=jnp.float32) + bh_b
        i_r, i_z, i_n = gi_s[:, :h_pad], gi_s[:, h_pad:2 * h_pad], gi_s[:, 2 * h_pad:]
        h_r, h_z, h_n = gh[:, :h_pad], gh[:, h_pad:2 * h_pad], gh[:, 2 * h_pad:]
        r = jax.nn.sigmoid(i_r + h_r)
        z = jax.nn.sigmoid(i_z + h_z)
        n = jnp.tanh(i_n + r * h_n)
        h_new = (1.0 - z) * n + z * h
        if mask_tail:
            valid = (t_idx * ts + s) < t_real                   # padded timesteps: keep h
            h_new = jnp.where(valid, h_new, h)
        return h_new

    h_final = jax.lax.fori_loop(0, ts, step, h_scratch[...], unroll=unroll)
    h_scratch[...] = h_final

    @pl.when(t_idx == nt - 1)
    def _():
        h_out_ref[...] = h_scratch[...].astype(h_out_ref.dtype)


def question_module_forward(questions, embedding_table, w_ih, w_hh, b_ih, b_hh,
                            *, slab_t=4):
    """
    questions:        (B, T) int32 token ids
    embedding_table:  (V, H) float32
    w_ih, w_hh:       (3H, H) PyTorch-layout GRU weights (gate order r, z, n)
    b_ih, b_hh:       (3H,)
    returns:          (B, 1, H) final GRU hidden state (h0 = 0)
    """
    B, T = questions.shape
    H = embedding_table.shape[1]

    # Pad to hardware tiles: lanes (128) on H, sublanes (8) on B.
    H_pad = _round_up(H, 128)
    B_pad = _round_up(B, 8)
    ts = min(slab_t, T)                        # time-slab size (raise for real sizes)
    T_pad = _round_up(T, ts)
    nt = T_pad // ts
    # Megacore: split batch into two parallel blocks when it is big enough (v7x).
    b_block = B_pad // 2 if (B_pad >= 16 and B_pad % 16 == 0) else B_pad
    nb = B_pad // b_block

    # Embedding gather directly into time-major layout (no (B,T,H) HBM transpose),
    # padded and cast to bf16 for the MXU.
    emb = jnp.pad(embedding_table.astype(jnp.float32), ((0, 0), (0, H_pad - H)))
    x = jnp.take(emb, questions.T, axis=0)                        # (T, B, H_pad)
    x = jnp.pad(x, ((0, T_pad - T), (0, B_pad - B), (0, 0)))
    x = x.astype(jnp.bfloat16)

    wi = _pack_gate_weight(w_ih.astype(jnp.float32), H, H_pad).astype(jnp.bfloat16)
    wh = _pack_gate_weight(w_hh.astype(jnp.float32), H, H_pad).astype(jnp.bfloat16)
    bi = _pack_gate_bias(b_ih.astype(jnp.float32), H, H_pad)
    bh = _pack_gate_bias(b_hh.astype(jnp.float32), H, H_pad)

    # Adaptive unroll: full unroll only while the per-step live (Bb, 3Hp) f32
    # temporaries stay comfortably inside the vreg file.
    live_bytes = b_block * 3 * H_pad * 4
    unroll = ts if live_bytes <= 32 * 1024 else max(1, min(ts, 2))

    kernel = functools.partial(
        gru_fused_kernel, t_real=T, ts=ts, unroll=unroll, mask_tail=(T_pad != T))

    h_final = pl.pallas_call(
        kernel,
        out_shape=jax.ShapeDtypeStruct((B_pad, H_pad), jnp.float32),
        grid_spec=pltpu.PrefetchScalarGridSpec(
            num_scalar_prefetch=0,
            grid=(nb, nt),                                   # (batch blocks, time slabs)
            in_specs=[
                pl.BlockSpec((ts, b_block, H_pad), lambda b, t: (t, b, 0)),   # x slab
                pl.BlockSpec((H_pad, 3 * H_pad), lambda b, t: (0, 0)),        # W_ih^T
                pl.BlockSpec((H_pad, 3 * H_pad), lambda b, t: (0, 0)),        # W_hh^T
                pl.BlockSpec((1, 3 * H_pad), lambda b, t: (0, 0)),            # b_ih
                pl.BlockSpec((1, 3 * H_pad), lambda b, t: (0, 0)),            # b_hh
            ],
            out_specs=pl.BlockSpec((b_block, H_pad), lambda b, t: (b, 0)),
            scratch_shapes=[
                pltpu.VMEM((ts, b_block, 3 * H_pad), jnp.float32),  # gi slab
                pltpu.VMEM((b_block, H_pad), jnp.float32),          # hidden-state carry
            ],
        ),
        compiler_params=pltpu.CompilerParams(
            dimension_semantics=("parallel", "arbitrary")),
        # NOTE: at large H/T raise vmem_limit_bytes via CompilerParams if needed.
    )(x, wi, wh, bi, bh)

    return h_final[:B, :H].reshape(B, 1, H)


def _reference_gru(x_tbh, w_ih, w_hh, b_ih, b_hh):
    """Pure-JAX f32 reference (PyTorch GRU semantics) for correctness checking."""
    H = x_tbh.shape[-1]

    def step(h, x):
        gi = x @ w_ih.T + b_ih
        gh = h @ w_hh.T + b_hh
        i_r, i_z, i_n = jnp.split(gi, 3, axis=-1)
        h_r, h_z, h_n = jnp.split(gh, 3, axis=-1)
        r = jax.nn.sigmoid(i_r + h_r)
        z = jax.nn.sigmoid(i_z + h_z)
        n = jnp.tanh(i_n + r * h_n)
        return (1.0 - z) * n + z * h, None

    h0 = jnp.zeros((x_tbh.shape[1], H), jnp.float32)
    h_final, _ = jax.lax.scan(step, h0, x_tbh)
    return h_final


if __name__ == "__main__":
    B, T, H, V = 2, 8, 32, 50

    key = jax.random.PRNGKey(0)
    k_q, k_emb, k_wih, k_whh, k_bih, k_bhh = jax.random.split(key, 6)

    questions = jax.random.randint(k_q, (B, T), 0, V, dtype=jnp.int32)
    embedding_table = jax.random.normal(k_emb, (V, H), dtype=jnp.float32) * 0.1

    # PyTorch default GRU init: uniform(-1/sqrt(H), 1/sqrt(H))
    bound = 1.0 / np.sqrt(H)
    w_ih = jax.random.uniform(k_wih, (3 * H, H), jnp.float32, -bound, bound)
    w_hh = jax.random.uniform(k_whh, (3 * H, H), jnp.float32, -bound, bound)
    b_ih = jax.random.uniform(k_bih, (3 * H,), jnp.float32, -bound, bound)
    b_hh = jax.random.uniform(k_bhh, (3 * H,), jnp.float32, -bound, bound)

    fwd = jax.jit(question_module_forward)
    out = jax.block_until_ready(fwd(questions, embedding_table, w_ih, w_hh, b_ih, b_hh))
    assert out.shape == (B, 1, H)

    # Cross-check against a pure-JAX f32 GRU reference (kernel uses bf16 MXU
    # operands, so tolerance is relaxed vs. pure-f32).
    x_tbh = jnp.transpose(jnp.take(embedding_table, questions, axis=0), (1, 0, 2))
    ref = _reference_gru(x_tbh, w_ih, w_hh, b_ih, b_hh).reshape(B, 1, H)
    np.testing.assert_allclose(np.asarray(out), np.asarray(ref), atol=1e-2, rtol=1e-2)

    print("KERNEL_OK")
</pallas_src>

<mosaic_0001>
module attributes {stable_mosaic.version = 11 : i64} {
  func.func @gru_fused_kernel(%arg0: i32, %arg1: i32, %arg2: memref<4x8x128xbf16, #tpu.memory_space<vmem>>, %arg3: memref<128x384xbf16, #tpu.memory_space<vmem>>, %arg4: memref<128x384xbf16, #tpu.memory_space<vmem>>, %arg5: memref<1x384xf32, #tpu.memory_space<vmem>>, %arg6: memref<1x384xf32, #tpu.memory_space<vmem>>, %arg7: memref<8x128xf32, #tpu.memory_space<vmem>>, %arg8: memref<4x8x384xf32, #tpu.memory_space<vmem>>, %arg9: memref<8x128xf32, #tpu.memory_space<vmem>>) attributes {dimension_semantics = [#tpu.dimension_semantics<parallel>, #tpu.dimension_semantics<arbitrary>], iteration_bounds = array<i64: 1, 2>, scalar_prefetch = 0 : i64, scratch_operands = 2 : i64, tpu.core_type = #tpu.core_type<tc>, window_params = [{transform_indices = @transform_0, window_bounds = array<i64: 4, 8, 128>}, {pipeline_mode = #tpu.pipeline_mode<synchronous>, transform_indices = @transform_1, window_bounds = array<i64: 128, 384>}, {pipeline_mode = #tpu.pipeline_mode<synchronous>, transform_indices = @transform_2, window_bounds = array<i64: 128, 384>}, {pipeline_mode = #tpu.pipeline_mode<synchronous>, transform_indices = @transform_3, window_bounds = array<i64: 1, 384>}, {pipeline_mode = #tpu.pipeline_mode<synchronous>, transform_indices = @transform_4, window_bounds = array<i64: 1, 384>}, {transform_indices = @transform_5, window_bounds = array<i64: 8, 128>}]} {
    %c0_i32 = arith.constant 0 : i32
    %0 = arith.cmpi eq, %arg1, %c0_i32 : i32
    %1 = arith.extui %0 : i1 to i32
    %c0_i32_0 = arith.constant 0 : i32
    %2 = arith.cmpi ne, %1, %c0_i32_0 : i32
    scf.if %2 {
      %cst_45 = arith.constant 0.000000e+00 : f32
      %149 = vector.broadcast %cst_45 : f32 to vector<8x128xf32>
      %c0_46 = arith.constant 0 : index
      %c0_47 = arith.constant 0 : index
      %150 = vector.load %arg9[%c0_46, %c0_47] : memref<8x128xf32, #tpu.memory_space<vmem>>, vector<8x128xf32>
      tpu.vector_store %arg9[%c0_46, %c0_47], %149 {strides = array<i32>} : memref<8x128xf32, #tpu.memory_space<vmem>>, vector<8x128xf32>,
    } else {
    }
    %c0 = arith.constant 0 : index
    %c0_1 = arith.constant 0 : index
    %c0_2 = arith.constant 0 : index
    %3 = vector.load %arg2[%c0, %c0_1, %c0_2] : memref<4x8x128xbf16, #tpu.memory_space<vmem>>, vector<4x8x128xbf16>
    %4 = vector.shape_cast %3 : vector<4x8x128xbf16> to vector<32x128xbf16>
    %c0_3 = arith.constant 0 : index
    %c0_4 = arith.constant 0 : index
    %5 = vector.load %arg3[%c0_3, %c0_4] : memref<128x384xbf16, #tpu.memory_space<vmem>>, vector<128x384xbf16>
    %cst = arith.constant dense<0.000000e+00> : vector<32x384xf32>
    %6 = tpu.matmul %4, %5, %cst {dimension_numbers = #tpu.dot_dimension_numbers<[1], [0], [0], [1], [0, 0, 1, 1], [], []>} : vector<32x128xbf16>, vector<128x384xbf16>, vector<32x384xf32> -> vector<32x384xf32>
    %c0_5 = arith.constant 0 : index
    %c0_6 = arith.constant 0 : index
    %7 = vector.load %arg5[%c0_5, %c0_6] : memref<1x384xf32, #tpu.memory_space<vmem>>, vector<1x384xf32>
    %8 = vector.broadcast %7 : vector<1x384xf32> to vector<32x384xf32>
    %9 = arith.addf %6, %8 : vector<32x384xf32>
    %10 = vector.shape_cast %9 : vector<32x384xf32> to vector<4x8x384xf32>
    %c0_7 = arith.constant 0 : index
    %c0_8 = arith.constant 0 : index
    %c0_9 = arith.constant 0 : index
    %11 = vector.load %arg8[%c0_7, %c0_8, %c0_9] : memref<4x8x384xf32, #tpu.memory_space<vmem>>, vector<4x8x384xf32>
    tpu.vector_store %arg8[%c0_7, %c0_8, %c0_9], %10 {strides = array<i32>} : memref<4x8x384xf32, #tpu.memory_space<vmem>>, vector<4x8x384xf32>,
    %c0_10 = arith.constant 0 : index
    %c0_11 = arith.constant 0 : index
    %12 = vector.load %arg4[%c0_10, %c0_11] : memref<128x384xbf16, #tpu.memory_space<vmem>>, vector<128x384xbf16>
    %c0_12 = arith.constant 0 : index
    %c0_13 = arith.constant 0 : index
    %13 = vector.load %arg6[%c0_12, %c0_13] : memref<1x384xf32, #tpu.memory_space<vmem>>, vector<1x384xf32>
    %14 = vector.shape_cast %13 : vector<1x384xf32> to vector<1x384xf32>
    %15 = vector.broadcast %14 : vector<1x384xf32> to vector<8x384xf32>
    %c0_14 = arith.constant 0 : index
    %c0_15 = arith.constant 0 : index
    %16 = vector.load %arg9[%c0_14, %c0_15] : memref<8x128xf32, #tpu.memory_space<vmem>>, vector<8x128xf32>
    %c0_i32_16 = arith.constant 0 : i32
    %17 = arith.index_cast %c0_i32_16 : i32 to index
    %c0_17 = arith.constant 0 : index
    %c0_18 = arith.constant 0 : index
    %18 = vector.load %arg8[%17, %c0_17, %c0_18] : memref<4x8x384xf32, #tpu.memory_space<vmem>>, vector<1x8x384xf32>
    %19 = vector.shape_cast %18 : vector<1x8x384xf32> to vector<8x384xf32>
    %20 = arith.truncf %16 : vector<8x128xf32> to vector<8x128xbf16>
    %cst_19 = arith.constant dense<0.000000e+00> : vector<8x384xf32>
    %21 = tpu.matmul %20, %12, %cst_19 {dimension_numbers = #tpu.dot_dimension_numbers<[1], [0], [0], [1], [0, 0, 1, 1], [], []>} : vector<8x128xbf16>, vector<128x384xbf16>, vector<8x384xf32> -> vector<8x384xf32>
    %22 = arith.addf %21, %15 : vector<8x384xf32>
    %23 = vector.extract_strided_slice %19 {offsets = [0, 0], sizes = [8, 128], strides = [1, 1]} : vector<8x384xf32> to vector<8x128xf32>
    %24 = vector.extract_strided_slice %19 {offsets = [0, 128], sizes = [8, 128], strides = [1, 1]} : vector<8x384xf32> to vector<8x128xf32>
    %25 = vector.extract_strided_slice %19 {offsets = [0, 256], sizes = [8, 128], strides = [1, 1]} : vector<8x384xf32> to vector<8x128xf32>
    %26 = vector.extract_strided_slice %22 {offsets = [0, 0], sizes = [8, 128], strides = [1, 1]} : vector<8x384xf32> to vector<8x128xf32>
    %27 = vector.extract_strided_slice %22 {offsets = [0, 128], sizes = [8, 128], strides = [1, 1]} : vector<8x384xf32> to vector<8x128xf32>
    %28 = vector.extract_strided_slice %22 {offsets = [0, 256], sizes = [8, 128], strides = [1, 1]} : vector<8x384xf32> to vector<8x128xf32>
    %29 = arith.addf %23, %26 : vector<8x128xf32>
    %30 = arith.negf %29 : vector<8x128xf32>
    %31 = math.exp %30 : vector<8x128xf32>
    %cst_20 = arith.constant 1.000000e+00 : f32
    %32 = vector.broadcast %cst_20 : f32 to vector<8x128xf32>
    %33 = arith.addf %32, %31 : vector<8x128xf32>
    %34 = arith.divf %32, %33 : vector<8x128xf32>
    %35 = arith.addf %24, %27 : vector<8x128xf32>
    %36 = arith.negf %35 : vector<8x128xf32>
    %37 = math.exp %36 : vector<8x128xf32>
    %cst_21 = arith.constant 1.000000e+00 : f32
    %38 = vector.broadcast %cst_21 : f32 to vector<8x128xf32>
    %39 = arith.addf %38, %37 : vector<8x128xf32>
    %40 = arith.divf %38, %39 : vector<8x128xf32>
    %41 = arith.mulf %34, %28 : vector<8x128xf32>
    %42 = arith.addf %25, %41 : vector<8x128xf32>
    %43 = math.tanh %42 : vector<8x128xf32>
    %cst_22 = arith.constant 1.000000e+00 : f32
    %44 = vector.broadcast %cst_22 : f32 to vector<8x128xf32>
    %45 = arith.subf %44, %40 : vector<8x128xf32>
    %46 = arith.mulf %45, %43 : vector<8x128xf32>
    %47 = arith.mulf %40, %16 : vector<8x128xf32>
    %48 = arith.addf %46, %47 : vector<8x128xf32>
    %c1_i32 = arith.constant 1 : i32
    %49 = arith.index_cast %c1_i32 : i32 to index
    %c0_23 = arith.constant 0 : index
    %c0_24 = arith.constant 0 : index
    %50 = vector.load %arg8[%49, %c0_23, %c0_24] : memref<4x8x384xf32, #tpu.memory_space<vmem>>, vector<1x8x384xf32>
    %51 = vector.shape_cast %50 : vector<1x8x384xf32> to vector<8x384xf32>
    %52 = arith.truncf %48 : vector<8x128xf32> to vector<8x128xbf16>
    %cst_25 = arith.constant dense<0.000000e+00> : vector<8x384xf32>
    %53 = tpu.matmul %52, %12, %cst_25 {dimension_numbers = #tpu.dot_dimension_numbers<[1], [0], [0], [1], [0, 0, 1, 1], [], []>} : vector<8x128xbf16>, vector<128x384xbf16>, vector<8x384xf32> -> vector<8x384xf32>
    %54 = arith.addf %53, %15 : vector<8x384xf32>
    %55 = vector.extract_strided_slice %51 {offsets = [0, 0], sizes = [8, 128], strides = [1, 1]} : vector<8x384xf32> to vector<8x128xf32>
    %56 = vector.extract_strided_slice %51 {offsets = [0, 128], sizes = [8, 128], strides = [1, 1]} : vector<8x384xf32> to vector<8x128xf32>
    %57 = vector.extract_strided_slice %51 {offsets = [0, 256], sizes = [8, 128], strides = [1, 1]} : vector<8x384xf32> to vector<8x128xf32>
    %58 = vector.extract_strided_slice %54 {offsets = [0, 0], sizes = [8, 128], strides = [1, 1]} : vector<8x384xf32> to vector<8x128xf32>
    %59 = vector.extract_strided_slice %54 {offsets = [0, 128], sizes = [8, 128], strides = [1, 1]} : vector<8x384xf32> to vector<8x128xf32>
    %60 = vector.extract_strided_slice %54 {offsets = [0, 256], sizes = [8, 128], strides = [1, 1]} : vector<8x384xf32> to vector<8x128xf32>
    %61 = arith.addf %55, %58 : vector<8x128xf32>
    %62 = arith.negf %61 : vector<8x128xf32>
    %63 = math.exp %62 : vector<8x128xf32>
    %cst_26 = arith.constant 1.000000e+00 : f32
    %64 = vector.broadcast %cst_26 : f32 to vector<8x128xf32>
    %65 = arith.addf %64, %63 : vector<8x128xf32>
    %66 = arith.divf %64, %65 : vector<8x128xf32>
    %67 = arith.addf %56, %59 : vector<8x128xf32>
    %68 = arith.negf %67 : vector<8x128xf32>
    %69 = math.exp %68 : vector<8x128xf32>
    %cst_27 = arith.constant 1.000000e+00 : f32
    %70 = vector.broadcast %cst_27 : f32 to vector<8x128xf32>
    %71 = arith.addf %70, %69 : vector<8x128xf32>
    %72 = arith.divf %70, %71 : vector<8x128xf32>
    %73 = arith.mulf %66, %60 : vector<8x128xf32>
    %74 = arith.addf %57, %73 : vector<8x128xf32>
    %75 = math.tanh %74 : vector<8x128xf32>
    %cst_28 = arith.constant 1.000000e+00 : f32
    %76 = vector.broadcast %cst_28 : f32 to vector<8x128xf32>
    %77 = arith.subf %76, %72 : vector<8x128xf32>
    %78 = arith.mulf %77, %75 : vector<8x128xf32>
    %79 = arith.mulf %72, %48 : vector<8x128xf32>
    %80 = arith.addf %78, %79 : vector<8x128xf32>
    %c2_i32 = arith.constant 2 : i32
    %81 = arith.index_cast %c2_i32 : i32 to index
    %c0_29 = arith.constant 0 : index
    %c0_30 = arith.constant 0 : index
    %82 = vector.load %arg8[%81, %c0_29, %c0_30] : memref<4x8x384xf32, #tpu.memory_space<vmem>>, vector<1x8x384xf32>
    %83 = vector.shape_cast %82 : vector<1x8x384xf32> to vector<8x384xf32>
    %84 = arith.truncf %80 : vector<8x128xf32> to vector<8x128xbf16>
    %cst_31 = arith.constant dense<0.000000e+00> : vector<8x384xf32>
    %85 = tpu.matmul %84, %12, %cst_31 {dimension_numbers = #tpu.dot_dimension_numbers<[1], [0], [0], [1], [0, 0, 1, 1], [], []>} : vector<8x128xbf16>, vector<128x384xbf16>, vector<8x384xf32> -> vector<8x384xf32>
    %86 = arith.addf %85, %15 : vector<8x384xf32>
    %87 = vector.extract_strided_slice %83 {offsets = [0, 0], sizes = [8, 128], strides = [1, 1]} : vector<8x384xf32> to vector<8x128xf32>
    %88 = vector.extract_strided_slice %83 {offsets = [0, 128], sizes = [8, 128], strides = [1, 1]} : vector<8x384xf32> to vector<8x128xf32>
    %89 = vector.extract_strided_slice %83 {offsets = [0, 256], sizes = [8, 128], strides = [1, 1]} : vector<8x384xf32> to vector<8x128xf32>
    %90 = vector.extract_strided_slice %86 {offsets = [0, 0], sizes = [8, 128], strides = [1, 1]} : vector<8x384xf32> to vector<8x128xf32>
    %91 = vector.extract_strided_slice %86 {offsets = [0, 128], sizes = [8, 128], strides = [1, 1]} : vector<8x384xf32> to vector<8x128xf32>
    %92 = vector.extract_strided_slice %86 {offsets = [0, 256], sizes = [8, 128], strides = [1, 1]} : vector<8x384xf32> to vector<8x128xf32>
    %93 = arith.addf %87, %90 : vector<8x128xf32>
    %94 = arith.negf %93 : vector<8x128xf32>
    %95 = math.exp %94 : vector<8x128xf32>
    %cst_32 = arith.constant 1.000000e+00 : f32
    %96 = vector.broadcast %cst_32 : f32 to vector<8x128xf32>
    %97 = arith.addf %96, %95 : vector<8x128xf32>
    %98 = arith.divf %96, %97 : vector<8x128xf32>
    %99 = arith.addf %88, %91 : vector<8x128xf32>
    %100 = arith.negf %99 : vector<8x128xf32>
    %101 = math.exp %100 : vector<8x128xf32>
    %cst_33 = arith.constant 1.000000e+00 : f32
    %102 = vector.broadcast %cst_33 : f32 to vector<8x128xf32>
    %103 = arith.addf %102, %101 : vector<8x128xf32>
    %104 = arith.divf %102, %103 : vector<8x128xf32>
    %105 = arith.mulf %98, %92 : vector<8x128xf32>
    %106 = arith.addf %89, %105 : vector<8x128xf32>
    %107 = math.tanh %106 : vector<8x128xf32>
    %cst_34 = arith.constant 1.000000e+00 : f32
    %108 = vector.broadcast %cst_34 : f32 to vector<8x128xf32>
    %109 = arith.subf %108, %104 : vector<8x128xf32>
    %110 = arith.mulf %109, %107 : vector<8x128xf32>
    %111 = arith.mulf %104, %80 : vector<8x128xf32>
    %112 = arith.addf %110, %111 : vector<8x128xf32>
    %c3_i32 = arith.constant 3 : i32
    %113 = arith.index_cast %c3_i32 : i32 to index
    %c0_35 = arith.constant 0 : index
    %c0_36 = arith.constant 0 : index
    %114 = vector.load %arg8[%113, %c0_35, %c0_36] : memref<4x8x384xf32, #tpu.memory_space<vmem>>, vector<1x8x384xf32>
    %115 = vector.shape_cast %114 : vector<1x8x384xf32> to vector<8x384xf32>
    %116 = arith.truncf %112 : vector<8x128xf32> to vector<8x128xbf16>
    %cst_37 = arith.constant dense<0.000000e+00> : vector<8x384xf32>
    %117 = tpu.matmul %116, %12, %cst_37 {dimension_numbers = #tpu.dot_dimension_numbers<[1], [0], [0], [1], [0, 0, 1, 1], [], []>} : vector<8x128xbf16>, vector<128x384xbf16>, vector<8x384xf32> -> vector<8x384xf32>
    %118 = arith.addf %117, %15 : vector<8x384xf32>
    %119 = vector.extract_strided_slice %115 {offsets = [0, 0], sizes = [8, 128], strides = [1, 1]} : vector<8x384xf32> to vector<8x128xf32>
    %120 = vector.extract_strided_slice %115 {offsets = [0, 128], sizes = [8, 128], strides = [1, 1]} : vector<8x384xf32> to vector<8x128xf32>
    %121 = vector.extract_strided_slice %115 {offsets = [0, 256], sizes = [8, 128], strides = [1, 1]} : vector<8x384xf32> to vector<8x128xf32>
    %122 = vector.extract_strided_slice %118 {offsets = [0, 0], sizes = [8, 128], strides = [1, 1]} : vector<8x384xf32> to vector<8x128xf32>
    %123 = vector.extract_strided_slice %118 {offsets = [0, 128], sizes = [8, 128], strides = [1, 1]} : vector<8x384xf32> to vector<8x128xf32>
    %124 = vector.extract_strided_slice %118 {offsets = [0, 256], sizes = [8, 128], strides = [1, 1]} : vector<8x384xf32> to vector<8x128xf32>
    %125 = arith.addf %119, %122 : vector<8x128xf32>
    %126 = arith.negf %125 : vector<8x128xf32>
    %127 = math.exp %126 : vector<8x128xf32>
    %cst_38 = arith.constant 1.000000e+00 : f32
    %128 = vector.broadcast %cst_38 : f32 to vector<8x128xf32>
    %129 = arith.addf %128, %127 : vector<8x128xf32>
    %130 = arith.divf %128, %129 : vector<8x128xf32>
    %131 = arith.addf %120, %123 : vector<8x128xf32>
    %132 = arith.negf %131 : vector<8x128xf32>
    %133 = math.exp %132 : vector<8x128xf32>
    %cst_39 = arith.constant 1.000000e+00 : f32
    %134 = vector.broadcast %cst_39 : f32 to vector<8x128xf32>
    %135 = arith.addf %134, %133 : vector<8x128xf32>
    %136 = arith.divf %134, %135 : vector<8x128xf32>
    %137 = arith.mulf %130, %124 : vector<8x128xf32>
    %138 = arith.addf %121, %137 : vector<8x128xf32>
    %139 = math.tanh %138 : vector<8x128xf32>
    %cst_40 = arith.constant 1.000000e+00 : f32
    %140 = vector.broadcast %cst_40 : f32 to vector<8x128xf32>
    %141 = arith.subf %140, %136 : vector<8x128xf32>
    %142 = arith.mulf %141, %139 : vector<8x128xf32>
    %143 = arith.mulf %136, %112 : vector<8x128xf32>
    %144 = arith.addf %142, %143 : vector<8x128xf32>
    %c4_i32 = arith.constant 4 : i32
    %c0_41 = arith.constant 0 : index
    %c0_42 = arith.constant 0 : index
    %145 = vector.load %arg9[%c0_41, %c0_42] : memref<8x128xf32, #tpu.memory_space<vmem>>, vector<8x128xf32>
    tpu.vector_store %arg9[%c0_41, %c0_42], %144 {strides = array<i32>} : memref<8x128xf32, #tpu.memory_space<vmem>>, vector<8x128xf32>,
    %c1_i32_43 = arith.constant 1 : i32
    %146 = arith.cmpi eq, %arg1, %c1_i32_43 : i32
    %147 = arith.extui %146 : i1 to i32
    %c0_i32_44 = arith.constant 0 : i32
    %148 = arith.cmpi ne, %147, %c0_i32_44 : i32
    scf.if %148 {
      %c0_45 = arith.constant 0 : index
      %c0_46 = arith.constant 0 : index
      %149 = vector.load %arg9[%c0_45, %c0_46] : memref<8x128xf32, #tpu.memory_space<vmem>>, vector<8x128xf32>
      %c0_47 = arith.constant 0 : index
      %c0_48 = arith.constant 0 : index
      %150 = vector.load %arg7[%c0_47, %c0_48] : memref<8x128xf32, #tpu.memory_space<vmem>>, vector<8x128xf32>
      tpu.vector_store %arg7[%c0_47, %c0_48], %149 {strides = array<i32>} : memref<8x128xf32, #tpu.memory_space<vmem>>, vector<8x128xf32>,
    } else {
    }
    return
  }
  func.func @transform_0(%arg0: i32, %arg1: i32) -> (i32, i32, i32) {
    %c0_i32 = arith.constant 0 : i32
    %c0_i32_0 = arith.constant 0 : i32
    return %arg1, %arg0, %c0_i32 : i32, i32, i32
  }
  func.func @transform_1(%arg0: i32, %arg1: i32) -> (i32, i32) {
    %c0_i32 = arith.constant 0 : i32
    %c0_i32_0 = arith.constant 0 : i32
    %c0_i32_1 = arith.constant 0 : i32
    return %c0_i32, %c0_i32_0 : i32, i32
  }
  func.func @transform_2(%arg0: i32, %arg1: i32) -> (i32, i32) {
    %c0_i32 = arith.constant 0 : i32
    %c0_i32_0 = arith.constant 0 : i32
    %c0_i32_1 = arith.constant 0 : i32
    return %c0_i32, %c0_i32_0 : i32, i32
  }
  func.func @transform_3(%arg0: i32, %arg1: i32) -> (i32, i32) {
    %c0_i32 = arith.constant 0 : i32
    %c0_i32_0 = arith.constant 0 : i32
    %c0_i32_1 = arith.constant 0 : i32
    return %c0_i32, %c0_i32_0 : i32, i32
  }
  func.func @transform_4(%arg0: i32, %arg1: i32) -> (i32, i32) {
    %c0_i32 = arith.constant 0 : i32
    %c0_i32_0 = arith.constant 0 : i32
    %c0_i32_1 = arith.constant 0 : i32
    return %c0_i32, %c0_i32_0 : i32, i32
  }
  func.func @transform_5(%arg0: i32, %arg1: i32) -> (i32, i32) {
    %c0_i32 = arith.constant 0 : i32
    %c0_i32_0 = arith.constant 0 : i32
    return %arg0, %c0_i32 : i32, i32
  }
}

</mosaic_0001>

<bundles_post_ra>
// kernel: question_module_forward.1
= control target key start
LH: loop header
LB: loop body
LE: loop exit
PB: predicated region body
PF: predicated region fallthrough
CT: control target
= control target key end

     0   :  { %s1496_s18 = smov 0   ;;  %s1498_s19 = smov 0   ;;  %s2047_s0 = inlined_call_operand.vmem [shape: bf16[8,8,128], index: 0, kind: input, shape index: {}]   ;;  %s2048_s1 = inlined_call_operand.vmem [shape: bf16[128,384], index: 1, kind: input, shape index: {}]   ;;  %s2049_s2 = inlined_call_operand.vmem [shape: bf16[128,384], index: 2, kind: input, shape index: {}]   ;;  %s2050_s3 = inlined_call_operand.vmem [shape: f32[1,384], index: 3, kind: input, shape index: {}]   ;;  %s2051_s4 = inlined_call_operand.vmem [shape: f32[1,384], index: 4, kind: input, shape index: {}]   ;;  %s2052_s5 = inlined_call_operand.vmem [shape: f32[8,128], index: 5, kind: output, shape index: {}]  }
   0x1   :  { %s1500_s20 = smov 0  }
   0x2 LB: > { %s24_s21 = sadd.s32 1, %s1459_s19  ;;  %p1110_p0 = scmp.ge.s32.totalorder %s1463_s20, 1  ;;  %s1463_s20 = sphi %s1500_s20, %s15_s20   ;;  %s1459_s19 = sphi %s1498_s19, %s2054_s19   ;;  %s1455_s18 = sphi %s1496_s18, %s2053_s18  }
   0x3   : > { %p25_p1 = scmp.ge.s32.totalorder %s24_s21, 2  ;;  %p205_p2 = scmp.lt.s32.totalorder %s1463_s20, 3 }
   0x5   : > { %s2056_s21 = smov (%p25_p1, %s24_s21), 0  ;;  %p206_p3 = pnand %p1110_p0, %p205_p2 }
   0x6   : > { %s1111_s22 = sshll.u32 (!%p206_p3), %s1455_s18, 2  ;;  %p1113_p5 = scmp.ne.s32.totalorder (!%p206_p3), %s1455_s18, 0 }
   0x7   : > { %209 = sbr.rel (%p206_p3) target bundleno = 789 (0x315), region = 40  ;;  %p236_p4 = scmp.lt.s32.totalorder (!%p206_p3), %s1111_s22, 7 }
   0xc   : > { %s2058_s22 = smov (!%p236_p4, %s1111_s22), 7  ;;  %251 = sbr.rel (%p1113_p5) target bundleno = 19 (0x13), region = 44 }
   0xd   : > { %s1112_s23 = sshll.u32 %s2058_s22, 2 }
   0xe   : > { %s1520_s26 = scalar_lea.vmem %s2047_s0, %s1112_s23 }
  0x11   : > { %v1465_v0 = vmov 0.0  }
  0x12   : > { %252 = vst [vmem:[#allocation3] sm:$0xff] %v1465_v0 }
  0x13 PF: > { %v1208_v1 = vld [vmem:[%s2048_s1 + $0xa8] sm:$0xf]  ;;  %v1350_v2 = vld [vmem:[%s2048_s1 + $0xb0] sm:$0xf0]  ;;  %v1196_v6 = vld [vmem:[%s2048_s1 + $0x90] sm:$0xf] }
  0x14   : > { %v1304_v3 = vld [vmem:[%s2049_s2 + $0xa8] sm:$0xf]  ;;  %v1209_v4 = vor.u32 %v1350_v2, %v1208_v1  ;;  %v1374_v5 = vld [vmem:[%s2049_s2 + $0xb0] sm:$0xf0]  ;;  %v1347_v7 = vld [vmem:[%s2048_s1 + $0x98] sm:$0xf0] }
  0x15   : > { %v1541_v8 = vor.u32 %v1374_v5, %v1304_v3  ;;  %v1349_v9 = vld [vmem:[%s2048_s1 + $0xac] sm:$0xf]  ;;  %v1210_v10 = vld [vmem:[%s2048_s1 + $0xb4] sm:$0xf0]  ;;  %v1292_v11 = vld [vmem:[%s2049_s2 + $0x90] sm:$0xf]  ;;  %v1197_v12 = vor.u32 %v1347_v7, %v1196_v6 }
  0x16   : > { %437 = vmatpush.bf16.msra.mxu0 %v1209_v4  ;;  %v1213_v13 = vor.u32 %v1349_v9, %v1210_v10  ;;  %v1371_v14 = vld [vmem:[%s2049_s2 + $0x98] sm:$0xf0]  ;;  %v1184_v15 = vld [vmem:[%s2048_s1 + $0x78] sm:$0xf]  ;;  %v1344_v17 = vld [vmem:[%s2048_s1 + $0x80] sm:$0xf0] }
  0x17   : > { %679 = vmatpush.bf16.msra.mxu3 %v1541_v8  ;;  %v1559_v16 = vor.u32 %v1371_v14, %v1292_v11  ;;  %v1346_v18 = vld [vmem:[%s2048_s1 + $0x94] sm:$0xf]  ;;  %v1198_v19 = vld [vmem:[%s2048_s1 + $0x9c] sm:$0xf0]  ;;  %v1280_v21 = vld [vmem:[%s2049_s2 + $0x78] sm:$0xf]  ;;  %v1185_v25 = vor.u32 %v1344_v17, %v1184_v15 }
  0x18   : > { %456 = vmatpush.bf16.msra.mxu1 %v1213_v13  ;;  %v1201_v20 = vor.u32 %v1346_v18, %v1198_v19  ;;  %v1368_v22 = vld [vmem:[%s2049_s2 + $0x80] sm:$0xf0]  ;;  %v1343_v23 = vld [vmem:[%s2048_s1 + $0x7c] sm:$0xf]  ;;  %v1186_v24 = vld [vmem:[%s2048_s1 + $0x84] sm:$0xf0] }
  0x19   : > { %v1583_v26 = vor.u32 %v1368_v22, %v1280_v21  ;;  %v1172_v27 = vld [vmem:[%s2048_s1 + $0x60] sm:$0xf]  ;;  %v1341_v28 = vld [vmem:[%s2048_s1 + $0x68] sm:$0xf0]  ;;  %v1189_v29 = vor.u32 %v1343_v23, %v1186_v24  ;;  %v1340_v32 = vld [vmem:[%s2048_s1 + $0x64] sm:$0xf] }
  0x1a   : > { %438 = vmatpush.bf16.msra.mxu0 %v1197_v12  ;;  %v1268_v30 = vld [vmem:[%s2049_s2 + $0x60] sm:$0xf]  ;;  %v1365_v31 = vld [vmem:[%s2049_s2 + $0x68] sm:$0xf0]  ;;  %v1174_v33 = vld [vmem:[%s2048_s1 + $0x6c] sm:$0xf0]  ;;  %v1173_v34 = vor.u32 %v1341_v28, %v1172_v27 }
  0x1b   : > { %680 = vmatpush.bf16.msra.mxu3 %v1559_v16  ;;  %v1604_v35 = vor.u32 %v1365_v31, %v1268_v30  ;;  %v1160_v36 = vld [vmem:[%s2048_s1 + $0x48] sm:$0xf]  ;;  %v1338_v37 = vld [vmem:[%s2048_s1 + $0x50] sm:$0xf0]  ;;  %v1177_v38 = vor.u32 %v1340_v32, %v1174_v33  ;;  %v1337_v41 = vld [vmem:[%s2048_s1 + $0x4c] sm:$0xf] }
  0x1c   : > { %457 = vmatpush.bf16.msra.mxu1 %v1201_v20  ;;  %v1256_v39 = vld [vmem:[%s2049_s2 + $0x48] sm:$0xf]  ;;  %v1362_v40 = vld [vmem:[%s2049_s2 + $0x50] sm:$0xf0]  ;;  %v1162_v42 = vld [vmem:[%s2048_s1 + $0x54] sm:$0xf0]  ;;  %v1161_v43 = vor.u32 %v1338_v37, %v1160_v36 }
  0x1d   : > { %v1625_v44 = vor.u32 %v1362_v40, %v1256_v39  ;;  %v1148_v45 = vld [vmem:[%s2048_s1 + $0x30] sm:$0xf]  ;;  %v1335_v46 = vld [vmem:[%s2048_s1 + $0x38] sm:$0xf0]  ;;  %v1165_v48 = vor.u32 %v1337_v41, %v1162_v42  ;;  %v1334_v52 = vld [vmem:[%s2048_s1 + $0x34] sm:$0xf] }
  0x1e   : > { %439 = vmatpush.bf16.msra.mxu0 %v1185_v25  ;;  %v1244_v47 = vld [vmem:[%s2049_s2 + $0x30] sm:$0xf]  ;;  %v1359_v49 = vld [vmem:[%s2049_s2 + $0x38] sm:$0xf0]  ;;  %v1150_v53 = vld [vmem:[%s2048_s1 + $0x3c] sm:$0xf0]  ;;  %v1149_v56 = vor.u32 %v1335_v46, %v1148_v45 }
  0x1f   : > { %681 = vmatpush.bf16.msra.mxu3 %v1583_v26  ;;  %v1216_v50 = vld [vmem:[%s2048_s1 + $0xb0] sm:$0xf]  ;;  %v1351_v51 = vld [vmem:[%s2048_s1 + $0xb8] sm:$0xf0]  ;;  %v1204_v55 = vld [vmem:[%s2048_s1 + $0x98] sm:$0xf]  ;;  %v1658_v58 = vor.u32 %v1359_v49, %v1244_v47  ;;  %v1153_v63 = vor.u32 %v1334_v52, %v1150_v53 }
  0x20   : > { %458 = vmatpush.bf16.msra.mxu1 %v1189_v29  ;;  %v1217_v54 = vor.u32 %v1351_v51, %v1216_v50  ;;  %v1348_v57 = vld [vmem:[%s2048_s1 + $0xa0] sm:$0xf0]  ;;  %v1136_v59 = vld [vmem:[%s2048_s1 + $0x18] sm:$0xf]  ;;  %v1192_v1 = vld [vmem:[%s2048_s1 + $0x80] sm:$0xf] }
  0x21   : > { %v1332_v60 = vld [vmem:[%s2048_s1 + $0x20] sm:$0xf0]  ;;  %v1232_v61 = vld [vmem:[%s2049_s2 + $0x18] sm:$0xf]  ;;  %v1205_v62 = vor.u32 %v1348_v57, %v1204_v55  ;;  %v1345_v2 = vld [vmem:[%s2048_s1 + $0x88] sm:$0xf0] }
  0x22   : > { %440 = vmatpush.bf16.msra.mxu0 %v1173_v34  ;;  %475 = vmatpush.bf16.msra.mxu2 %v1217_v54  ;;  %v1356_v0 = vld [vmem:[%s2049_s2 + $0x20] sm:$0xf0]  ;;  %v1331_v3 = vld [vmem:[%s2048_s1 + $0x1c] sm:$0xf]  ;;  %v1138_v4 = vld [vmem:[%s2048_s1 + $0x24] sm:$0xf0]  ;;  %v1137_v5 = vor.u32 %v1332_v60, %v1136_v59  ;;  %v1193_v12 = vor.u32 %v1345_v2, %v1192_v1 }
  0x23   : > { %682 = vmatpush.bf16.msra.mxu3 %v1604_v35  ;;  %v1124_v6 = vld [vmem:[%s2048_s1] sm:$0xf]  ;;  %v1688_v7 = vor.u32 %v1356_v0, %v1232_v61  ;;  %v1329_v9 = vld [vmem:[%s2048_s1 + $0x8] sm:$0xf0]  ;;  %v1141_v13 = vor.u32 %v1331_v3, %v1138_v4  ;;  %v1306_v15 = vld [vmem:[%s2049_s2 + $0xb4] sm:$0xf0] }
  0x24   : > { %459 = vmatpush.bf16.msra.mxu1 %v1177_v38  ;;  %v1220_v10 = vld [vmem:[%s2049_s2] sm:$0xf]  ;;  %v1353_v11 = vld [vmem:[%s2049_s2 + $0x8] sm:$0xf0]  ;;  %v1328_v17 = vld [vmem:[%s2048_s1 + $0x4] sm:$0xf]  ;;  %v1125_v21 = vor.u32 %v1329_v9, %v1124_v6 }
  0x25   : > { %v1373_v14 = vld [vmem:[%s2049_s2 + $0xac] sm:$0xf]  ;;  %v1126_v18 = vld [vmem:[%s2048_s1 + $0xc] sm:$0xf0]  ;;  %v1180_v19 = vld [vmem:[%s2048_s1 + $0x68] sm:$0xf]  ;;  %v1724_v24 = vor.u32 %v1353_v11, %v1220_v10 }
  0x26   : > { %441 = vmatpush.bf16.msra.mxu0 %v1161_v43  ;;  %476 = vmatpush.bf16.msra.mxu2 %v1205_v62  ;;  %v1342_v20 = vld [vmem:[%s2048_s1 + $0x70] sm:$0xf0]  ;;  %v1312_v22 = vld [vmem:[%s2049_s2 + $0xb0] sm:$0xf]  ;;  %v1375_v23 = vld [vmem:[%s2049_s2 + $0xb8] sm:$0xf0]  ;;  %v1728_v27 = vor.u32 %v1373_v14, %v1306_v15  ;;  %v1129_v28 = vor.u32 %v1328_v17, %v1126_v18 }
  0x27   : > { %683 = vmatpush.bf16.msra.mxu3 %v1625_v44  ;;  %v1726_v25 = vld [vmem:[#allocation3] sm:$0xff]  ;;  %v1370_v29 = vld [vmem:[%s2049_s2 + $0x94] sm:$0xf]  ;;  %v1181_v31 = vor.u32 %v1342_v20, %v1180_v19  ;;  %v1739_v33 = vor.u32 %v1375_v23, %v1312_v22  ;;  %v1168_v34 = vld [vmem:[%s2048_s1 + $0x50] sm:$0xf]  ;;  %p1322_p6 = scmp.ne.s32.totalorder %s1455_s18, 1 }
  0x28   : > { %460 = vmatpush.bf16.msra.mxu1 %v1165_v48  ;;  %v1294_v30 = vld [vmem:[%s2049_s2 + $0x9c] sm:$0xf0]  ;;  %v1339_v36 = vld [vmem:[%s2048_s1 + $0x58] sm:$0xf0]  ;;  %v1749_v37 = vpack.c.bf16 %v1726_v25, %v1726_v25  ;;  %v1300_v38 = vld [vmem:[%s2049_s2 + $0x98] sm:$0xf] }
  0x29   : > { %v1737_v32 = vld [vmem:[%s1520_s26] sm:$0xff]  ;;  %v1759_v40 = vor.u32 %v1370_v29, %v1294_v30  ;;  %v1367_v41 = vld [vmem:[%s2049_s2 + $0x7c] sm:$0xf]  ;;  %v1282_v42 = vld [vmem:[%s2049_s2 + $0x84] sm:$0xf0]  ;;  %v1169_v43 = vor.u32 %v1339_v36, %v1168_v34 }
  0x2a   : > { %442 = vmatpush.bf16.msra.mxu0 %v1149_v56  ;;  %477 = vmatpush.bf16.msra.mxu2 %v1193_v12  ;;  %v1372_v39 = vld [vmem:[%s2049_s2 + $0xa0] sm:$0xf0]  ;;  %v1156_v46 = vld [vmem:[%s2048_s1 + $0x38] sm:$0xf]  ;;  %v1288_v48 = vld [vmem:[%s2049_s2 + $0x80] sm:$0xf]  ;;  %v1786_v50 = vor.u32 %v1367_v41, %v1282_v42 }
  0x2b   : > { %684 = vmatpush.bf16.msra.mxu3 %v1658_v58  ;;  %v1769_v45 = vor.u32 %v1372_v39, %v1300_v38  ;;  %v1336_v47 = vld [vmem:[%s2048_s1 + $0x40] sm:$0xf0]  ;;  %v1369_v49 = vld [vmem:[%s2049_s2 + $0x88] sm:$0xf0]  ;;  %v1270_v52 = vld [vmem:[%s2049_s2 + $0x6c] sm:$0xf0] }
  0x2c   : > { %461 = vmatpush.bf16.msra.mxu1 %v1153_v63  ;;  %v1364_v51 = vld [vmem:[%s2049_s2 + $0x64] sm:$0xf]  ;;  %v1157_v53 = vor.u32 %v1336_v47, %v1156_v46  ;;  %v1796_v54 = vor.u32 %v1369_v49, %v1288_v48  ;;  %v1144_v55 = vld [vmem:[%s2048_s1 + $0x20] sm:$0xf]  ;;  %v1333_v56 = vld [vmem:[%s2048_s1 + $0x28] sm:$0xf0] }
  0x2d   : > { %v1276_v57 = vld [vmem:[%s2049_s2 + $0x68] sm:$0xf]  ;;  %v1366_v59 = vld [vmem:[%s2049_s2 + $0x70] sm:$0xf0]  ;;  %v1811_v60 = vor.u32 %v1364_v51, %v1270_v52  ;;  %v1361_v61 = vld [vmem:[%s2049_s2 + $0x4c] sm:$0xf]  ;;  %v1145_v63 = vor.u32 %v1333_v56, %v1144_v55 }
  0x2e   : > { %443 = vmatpush.bf16.msra.mxu0 %v1137_v5  ;;  %478 = vmatpush.bf16.msra.mxu2 %v1181_v31  ;;  %v1258_v62 = vld [vmem:[%s2049_s2 + $0x54] sm:$0xf0]  ;;  %v1821_v0 = vor.u32 %v1366_v59, %v1276_v57  ;;  %v1132_v1 = vld [vmem:[%s2048_s1 + $0x8] sm:$0xf]  ;;  %v1330_v2 = vld [vmem:[%s2048_s1 + $0x10] sm:$0xf0] }
  0x2f   : > { %685 = vmatpush.bf16.msra.mxu3 %v1688_v7  ;;  %v1264_v3 = vld [vmem:[%s2049_s2 + $0x50] sm:$0xf]  ;;  %v1363_v4 = vld [vmem:[%s2049_s2 + $0x58] sm:$0xf0]  ;;  %v1836_v5 = vor.u32 %v1361_v61, %v1258_v62  ;;  %v1358_v6 = vld [vmem:[%s2049_s2 + $0x34] sm:$0xf]  ;;  %v1133_v10 = vor.u32 %v1330_v2, %v1132_v1 }
  0x30   : > { %462 = vmatpush.bf16.msra.mxu1 %v1141_v13  ;;  %v1246_v9 = vld [vmem:[%s2049_s2 + $0x3c] sm:$0xf0]  ;;  %v1327_v11 = vld [vmem:[%s1520_s26 + $0x8] sm:$0xff]  ;;  %v1847_v12 = vor.u32 %v1363_v4, %v1264_v3  ;;  %v1252_v13 = vld [vmem:[%s2049_s2 + $0x38] sm:$0xf] }
  0x31   : > { %v1360_v14 = vld [vmem:[%s2049_s2 + $0x40] sm:$0xf0]  ;;  %v1856_v15 = vor.u32 %v1358_v6, %v1246_v9  ;;  %v1355_v17 = vld [vmem:[%s2049_s2 + $0x1c] sm:$0xf]  ;;  %v1234_v18 = vld [vmem:[%s2049_s2 + $0x24] sm:$0xf0] }
  0x32   : > { %444 = vmatpush.bf16.msra.mxu0 %v1125_v21  ;;  %479 = vmatpush.bf16.msra.mxu2 %v1169_v43  ;;  %v1866_v19 = vor.u32 %v1360_v14, %v1252_v13  ;;  %v1240_v20 = vld [vmem:[%s2049_s2 + $0x20] sm:$0xf]  ;;  %v1357_v21 = vld [vmem:[%s2049_s2 + $0x28] sm:$0xf0]  ;;  %v1876_v22 = vor.u32 %v1355_v17, %v1234_v18  ;;  %v1352_v23 = vld [vmem:[%s2049_s2 + $0x4] sm:$0xf] }
  0x33   : > { %686 = vmatpush.bf16.msra.mxu3 %v1724_v24  ;;  %v1887_v29 = vor.u32 %v1357_v21, %v1240_v20  ;;  %v1228_v30 = vld [vmem:[%s2049_s2 + $0x8] sm:$0xf]  ;;  %v1354_v31 = vld [vmem:[%s2049_s2 + $0x10] sm:$0xf0] }
  0x34   : > { %463 = vmatpush.bf16.msra.mxu1 %v1129_v28  ;;  %v1222_v28 = vld [vmem:[%s2049_s2 + $0xc] sm:$0xf0] }
  0x35   : > { %445 = vmatmul.bf16.vlgmr.msra.gmra.mxu0 %v1737_v32  ;;  %v1897_v34 = vor.u32 %v1352_v23, %v1222_v28 }
  0x36   : > { %692 = vmatpush.bf16.msrb.mxu0 %v1728_v27  ;;  %687 = vmatmul.bf16.vlgmr.msra.gmra.mxu3 %v1749_v37 }
  0x37   : > { %464 = vmatmul.bf16.vlgmr.msra.gmra.mxu1 %v1737_v32  ;;  %783 = vmatpush.bf16.msrb.mxu3 %v1728_v27 }
  0x38   : > { %705 = vmatpush.bf16.msrb.mxu1 %v1739_v33  ;;  %480 = vmatpush.bf16.msra.mxu2 %v1157_v53 }
  0x3a   : > { %693 = vmatpush.bf16.msrb.mxu0 %v1759_v40 }
  0x3b   : > { %784 = vmatpush.bf16.msrb.mxu3 %v1759_v40 }
  0x3c   : > { %706 = vmatpush.bf16.msrb.mxu1 %v1769_v45  ;;  %481 = vmatpush.bf16.msra.mxu2 %v1145_v63 }
  0x3e   : > { %694 = vmatpush.bf16.msrb.mxu0 %v1786_v50 }
  0x3f   : > { %785 = vmatpush.bf16.msrb.mxu3 %v1786_v50 }
  0x40   : > { %707 = vmatpush.bf16.msrb.mxu1 %v1796_v54  ;;  %482 = vmatpush.bf16.msra.mxu2 %v1133_v10 }
  0x42   : > { %695 = vmatpush.bf16.msrb.mxu0 %v1811_v60 }
  0x43   : > { %786 = vmatpush.bf16.msrb.mxu3 %v1811_v60  ;;  %483 = vmatmul.bf16.vlgmr.msra.gmra.mxu2 %v1737_v32  ;;  %v1901_v32 = vor.u32 %v1354_v31, %v1228_v30 }
  0x44   : > { %708 = vmatpush.bf16.msrb.mxu1 %v1821_v0  ;;  %770 = vmatpush.bf16.msrb.mxu2 %v1541_v8 }
  0x45   : > { %450 = vmatmul.bf16.gmra.mxu0 %v1327_v11 }
  0x46   : > { %696 = vmatpush.bf16.msrb.mxu0 %v1836_v5 }
  0x47   : > { %469 = vmatmul.bf16.gmra.mxu1 %v1327_v11  ;;  %787 = vmatpush.bf16.msrb.mxu3 %v1836_v5 }
  0x48   : > { %709 = vmatpush.bf16.msrb.mxu1 %v1847_v12  ;;  %771 = vmatpush.bf16.msrb.mxu2 %v1559_v16 }
  0x4a   : > { %697 = vmatpush.bf16.msrb.mxu0 %v1856_v15 }
  0x4b   : > { %788 = vmatpush.bf16.msrb.mxu3 %v1856_v15 }
  0x4c   : > { %710 = vmatpush.bf16.msrb.mxu1 %v1866_v19  ;;  %772 = vmatpush.bf16.msrb.mxu2 %v1583_v26 }
  0x4e   : > { %698 = vmatpush.bf16.msrb.mxu0 %v1876_v22 }
  0x4f   : > { %789 = vmatpush.bf16.msrb.mxu3 %v1876_v22 }
  0x50   : > { %711 = vmatpush.bf16.msrb.mxu1 %v1887_v29  ;;  %773 = vmatpush.bf16.msrb.mxu2 %v1604_v35 }
  0x52   : > { %699 = vmatpush.bf16.msrb.mxu0 %v1897_v34 }
  0x53   : > { %790 = vmatpush.bf16.msrb.mxu3 %v1897_v34  ;;  %488 = vmatmul.bf16.gmra.mxu2 %v1327_v11 }
  0x54   : > { %712 = vmatpush.bf16.msrb.mxu1 %v1901_v32  ;;  %774 = vmatpush.bf16.msrb.mxu2 %v1625_v44 }
  0x55   : > { %700 = vmatmul.bf16.vlgmr.msrb.gmra.mxu0 %v1749_v37 }
  0x56   : > { %796 = vmatpush.bf16.msra.mxu0 %v1739_v33 }
  0x57   : > { %887 = vmatpush.bf16.msra.mxu3 %v1739_v33  ;;  %713 = vmatmul.bf16.vlgmr.msrb.gmra.mxu1 %v1749_v37 }
  0x58   : > { %861 = vmatpush.bf16.msra.mxu1 %v1541_v8  ;;  %775 = vmatpush.bf16.msrb.mxu2 %v1658_v58 }
  0x5a   : > { %797 = vmatpush.bf16.msra.mxu0 %v1769_v45 }
  0x5b   : > { %888 = vmatpush.bf16.msra.mxu3 %v1769_v45 }
  0x5c   : > { %862 = vmatpush.bf16.msra.mxu1 %v1559_v16  ;;  %776 = vmatpush.bf16.msrb.mxu2 %v1688_v7 }
  0x5e   : > { %798 = vmatpush.bf16.msra.mxu0 %v1796_v54 }
  0x5f   : > { %889 = vmatpush.bf16.msra.mxu3 %v1796_v54 }
  0x60   : > { %863 = vmatpush.bf16.msra.mxu1 %v1583_v26  ;;  %777 = vmatpush.bf16.msrb.mxu2 %v1724_v24 }
  0x62   : > { %799 = vmatpush.bf16.msra.mxu0 %v1821_v0 }
  0x63   : > { %890 = vmatpush.bf16.msra.mxu3 %v1821_v0 }
  0x64   : > { %864 = vmatpush.bf16.msra.mxu1 %v1604_v35  ;;  %874 = vmatpush.bf16.msra.mxu2 %v1728_v27 }
  0x66   : > { %800 = vmatpush.bf16.msra.mxu0 %v1847_v12 }
  0x67   : > { %891 = vmatpush.bf16.msra.mxu3 %v1847_v12 }
  0x68   : > { %865 = vmatpush.bf16.msra.mxu1 %v1625_v44  ;;  %875 = vmatpush.bf16.msra.mxu2 %v1759_v40 }
  0x6a   : > { %801 = vmatpush.bf16.msra.mxu0 %v1866_v19 }
  0x6b   : > { %892 = vmatpush.bf16.msra.mxu3 %v1866_v19 }
  0x6c   : > { %866 = vmatpush.bf16.msra.mxu1 %v1658_v58  ;;  %876 = vmatpush.bf16.msra.mxu2 %v1786_v50 }
  0x6e   : > { %802 = vmatpush.bf16.msra.mxu0 %v1887_v29 }
  0x6f   : > { %893 = vmatpush.bf16.msra.mxu3 %v1887_v29 }
  0x70   : > { %867 = vmatpush.bf16.msra.mxu1 %v1688_v7  ;;  %877 = vmatpush.bf16.msra.mxu2 %v1811_v60 }
  0x72   : > { %803 = vmatpush.bf16.msra.mxu0 %v1901_v32 }
  0x73   : > { %894 = vmatpush.bf16.msra.mxu3 %v1901_v32 }
  0x74   : > { %868 = vmatpush.bf16.msra.mxu1 %v1724_v24  ;;  %878 = vmatpush.bf16.msra.mxu2 %v1836_v5 }
  0x76   : > { %952 = vmatpush.bf16.msrb.mxu0 %v1541_v8 }
  0x78   : > { %965 = vmatpush.bf16.msrb.mxu1 %v1728_v27  ;;  %879 = vmatpush.bf16.msra.mxu2 %v1856_v15 }
  0x7a   : > { %953 = vmatpush.bf16.msrb.mxu0 %v1559_v16  ;;  %v289_v16 = vld [vmem:[%s2050_s3] sm:$0x7] }
  0x7b   : > { %v1989_v11 = vperm.slane %v289_v16, 2 }
  0x7c   : > { %966 = vmatpush.bf16.msrb.mxu1 %v1759_v40  ;;  %880 = vmatpush.bf16.msra.mxu2 %v1876_v22 }
  0x7e   : > { %954 = vmatpush.bf16.msrb.mxu0 %v1583_v26  ;;  %v538_v26 = vld [vmem:[%s2051_s4] sm:$0x7] }
  0x7f   : > { %v1994_v20 = vperm.slane %v538_v26, 2 }
  0x80   : > { %967 = vmatpush.bf16.msrb.mxu1 %v1786_v50  ;;  %881 = vmatpush.bf16.msra.mxu2 %v1897_v34 }
  0x82   : > { %955 = vmatpush.bf16.msrb.mxu0 %v1604_v35 }
  0x84   : > { %968 = vmatpush.bf16.msrb.mxu1 %v1811_v60  ;;  %v1984_v60 = vperm.slane %v538_v26, 1 }
  0x86   : > { %956 = vmatpush.bf16.msrb.mxu0 %v1625_v44  ;;  %v291_v44 = vperm.slane %v289_v16, 0 }
  0x88   : > { %969 = vmatpush.bf16.msrb.mxu1 %v1836_v5 }
  0x8a   : > { %957 = vmatpush.bf16.msrb.mxu0 %v1658_v58  ;;  %v1969_v58 = vperm.slane %v538_v26, 0 }
  0x8c   : > { %970 = vmatpush.bf16.msrb.mxu1 %v1856_v15 }
  0x8e   : > { %958 = vmatpush.bf16.msrb.mxu0 %v1688_v7  ;;  %v292_v7 = vperm.slane %v289_v16, 1 }
  0x90   : > { %971 = vmatpush.bf16.msrb.mxu1 %v1876_v22 }
  0x92   : > { %959 = vmatpush.bf16.msrb.mxu0 %v1724_v24 }
  0x94   : > { %972 = vmatpush.bf16.msrb.mxu1 %v1897_v34 }
  0xb2   : > { %v446_v8 = vpop.f32.mrf.mxu0 }
  0xb3   : > { %v447_v36 = vadd.f32 %v446_v8, %v291_v44 }
  0xb4   : > { %v465_v35 = vpop.f32.mrf.mxu1 }
  0xb5   : > { %v466_v63 = vadd.f32 %v465_v35, %v292_v7 }
  0xb9   : > { %v688_v27 = vpop.f32.mrf.mxu3 }
  0xba   : > { %v689_v24 = vadd.f32 %v688_v27, %v1969_v58  ;;  %v448_v37 = vpop.f32.mrf.mxu0 }
  0xbb   : > { %v1972_v38 = vadd.f32 %v448_v37, %v291_v44 }
  0xbc   : > { %v718_v39 = vadd.f32 %v689_v24, %v447_v36  ;;  %v467_v40 = vpop.f32.mrf.mxu1 }
  0xbd   : > { %v1974_v41 = vadd.f32 %v467_v40, %v292_v7 }
  0xbe   : > { %v1314_v42 = vmul.f32 -1.442695, %v718_v39 }
  0xc0   : > { %1401 = vpow2.f32 %v1314_v42 }
  0xc1   : > { %v690_v43 = vpop.f32.mrf.mxu3 }
  0xc2   : > { %v451_v46 = vpop.f32.mrf.mxu0 }
  0xc3   : > { %v1976_v47 = vadd.f32 %v451_v46, %v291_v44 }
  0xc4   : > { %v470_v48 = vpop.f32.mrf.mxu1 }
  0xc5   : > { %v1978_v49 = vadd.f32 %v470_v48, %v292_v7 }
  0xc6   : > { %v1402_v50 = vpop.eup %1401  ;;  %v484_v56 = vpop.f32.mrf.mxu2 }
  0xc7   : > { %v722_v51 = vadd.f32 1.0, %v1402_v50  ;;  %v485_v16 = vadd.f32 %v484_v56, %v1989_v11 }
  0xc9   : > { %1403 = vrcp.f32 %v722_v51  ;;  %v734_v17 = vand.u32 2147483648, %v722_v51  ;;  %vm728_vm1 = vweird.f32 %v722_v51  ;;  %v732_v21 = vand.u32 2147483647, %v722_v51 }
  0xca   : > { %v453_v52 = vpop.f32.mrf.mxu0 }
  0xcb   : > { %v1980_v53 = vadd.f32 %v453_v52, %v291_v44  ;;  %v735_v30 = vor.u32 1.1754944e-38, %v734_v17  ;;  %vm733_vm3 = vcmp.eq.f32.partialorder %v732_v21, 8.507059e+37 }
  0xcc   : > { %v472_v55 = vpop.f32.mrf.mxu1 }
  0xcd   : > { %v1982_v57 = vadd.f32 %v472_v55, %v292_v7 }
  0xce   : > { %v1987_v4 = vpop.f32.mrf.mxu2 }
  0xcf   : > { %v1404_v59 = vpop.eup %1403 }
  0xd0   : > { %v724_v61 = vmul.f32 %v1404_v59, %v722_v51  ;;  %vm729_vm0 = vweird.f32 %v1404_v59 }
  0xd1   : > { %vm730_vm2 = vmor %vm728_vm1, %vm729_vm0 }
  0xd2   : > { %v701_v62 = vpop.f32.mrf.mxu0  ;;  %v725_v3 = vsub.f32 1.0, %v724_v61 }
  0xd3   : > { %v702_v1 = vadd.f32 %v701_v62, %v1984_v60 }
  0xd4   : > { %v714_v2 = vpop.f32.mrf.mxu1  ;;  %v726_v9 = vmul.f32 %v1404_v59, %v725_v3 }
  0xd5   : > { %v738_v5 = vadd.f32 %v702_v1, %v466_v63  ;;  %v715_v31 = vadd.f32 %v714_v2, %v1994_v20 }
  0xd6   : > { %v727_v13 = vadd.f32 %v1404_v59, %v726_v9  ;;  %v489_v15 = vpop.f32.mrf.mxu2 }
  0xd7   : > { %v1315_v6 = vmul.f32 -1.442695, %v738_v5  ;;  %v1992_v18 = vadd.f32 %v489_v15, %v1989_v11 }
  0xd8   : > { %v731_v28 = vsel %vm730_vm2, %v1404_v59, %v727_v13 }
  0xd9   : > { %1405 = vpow2.f32 %v1315_v6  ;;  %v736_v34 = vsel %vm733_vm3, %v735_v30, %v731_v28 }
  0xda   : > { %v703_v10 = vpop.f32.mrf.mxu0  ;;  %v758_v8 = vmul.f32 %v736_v34, %v715_v31  ;;  %v487_v31 = vadd.f32 %v1987_v4, %v1989_v11 }
  0xdc   : > { %v716_v14 = vpop.f32.mrf.mxu1  ;;  %v759_v7 = vadd.f32 %v758_v8, %v485_v16 }
  0xdf   : > { %v1406_v22 = vpop.eup %1405 }
  0xe0   : > { %v742_v23 = vadd.f32 1.0, %v1406_v22 }
  0xe2   : > { %1407 = vrcp.f32 %v742_v23  ;;  %v754_v27 = vand.u32 2147483648, %v742_v23  ;;  %v752_v24 = vand.u32 2147483647, %v742_v23  ;;  %vm748_vm5 = vweird.f32 %v742_v23 }
  0xe3   : > { %1409 = vtanh.f32 %v759_v7 }
  0xe4   : > { %v755_v39 = vor.u32 1.1754944e-38, %v754_v27  ;;  %vm753_vm7 = vcmp.eq.f32.partialorder %v752_v24, 8.507059e+37 }
  0xe8   : > { %v1408_v35 = vpop.eup %1407 }
  0xe9   : > { %v744_v44 = vmul.f32 %v1408_v35, %v742_v23  ;;  %vm749_vm4 = vweird.f32 %v1408_v35  ;;  %v1410_v46 = vpop.eup %1409 }
  0xea   : > { %vm750_vm6 = vmor %vm748_vm5, %vm749_vm4 }
  0xeb   : > { %v745_v26 = vsub.f32 1.0, %v744_v44 }
  0xed   : > { %v746_v36 = vmul.f32 %v1408_v35, %v745_v26 }
  0xef   : > { %v747_v37 = vadd.f32 %v1408_v35, %v746_v36 }
  0xf1   : > { %v751_v40 = vsel %vm750_vm6, %v1408_v35, %v747_v37 }
  0xf2   : > { %v756_v42 = vsel %vm753_vm7, %v755_v39, %v751_v40 }
  0xf3   : > { %v761_v43 = vsub.f32 1.0, %v756_v42  ;;  %v763_v50 = vmul.f32 %v756_v42, %v1726_v25  ;;  %v2011_v25 = vpop.f32.mrf.mxu2 }
  0xf5   : > { %v762_v48 = vmul.f32 %v1410_v46, %v761_v43 }
  0xf7   : > { %v1999_v51 = vadd.f32 %v763_v50, %v762_v48 }
  0xf9   : > { %v769_v52 = vpack.c.bf16 %v1999_v51, %v1999_v51 }
  0xfb   : > { %778 = vmatmul.bf16.vlgmr.msrb.gmra.mxu2 %v769_v52  ;;  %791 = vmatmul.bf16.vlgmr.msrb.gmra.mxu3 %v769_v52 }
  0xfc   : > { %804 = vmatmul.bf16.vlgmr.msra.gmra.mxu0 %v769_v52  ;;  %978 = vmatpush.bf16.msrb.mxu2 %v1739_v33 }
 0x100   : > { %979 = vmatpush.bf16.msrb.mxu2 %v1769_v45 }
 0x104   : > { %980 = vmatpush.bf16.msrb.mxu2 %v1796_v54 }
 0x108   : > { %981 = vmatpush.bf16.msrb.mxu2 %v1821_v0 }
 0x10c   : > { %982 = vmatpush.bf16.msrb.mxu2 %v1847_v12 }
 0x110   : > { %983 = vmatpush.bf16.msrb.mxu2 %v1866_v19 }
 0x114   : > { %984 = vmatpush.bf16.msrb.mxu2 %v1887_v29 }
 0x118   : > { %985 = vmatpush.bf16.msrb.mxu2 %v1901_v32 }
 0x179   : > { %v805_v55 = vpop.f32.mrf.mxu0 }
 0x17a   : > { %v806_v22 = vadd.f32 %v805_v55, %v1994_v20 }
 0x17e   : > { %v779_v56 = vpop.f32.mrf.mxu2  ;;  %v792_v59 = vpop.f32.mrf.mxu3 }
 0x17f   : > { %v780_v33 = vadd.f32 %v779_v56, %v1969_v58  ;;  %v793_v45 = vadd.f32 %v792_v59, %v1984_v60 }
 0x181   : > { %v809_v54 = vadd.f32 %v780_v33, %v1972_v38  ;;  %v829_v0 = vadd.f32 %v793_v45, %v1974_v41  ;;  %v807_v12 = vpop.f32.mrf.mxu0 }
 0x183   : > { %v1316_v61 = vmul.f32 -1.442695, %v809_v54  ;;  %v1317_v19 = vmul.f32 -1.442695, %v829_v0 }
 0x185   : > { %1411 = vpow2.f32 %v1316_v61 }
 0x186   : > { %1413 = vpow2.f32 %v1317_v19  ;;  %v781_v29 = vpop.f32.mrf.mxu2  ;;  %v794_v32 = vpop.f32.mrf.mxu3 }
 0x18b   : > { %v1412_v62 = vpop.eup %1411 }
 0x18c   : > { %v1414_v63 = vpop.eup %1413  ;;  %v813_v1 = vadd.f32 1.0, %v1412_v62 }
 0x18d   : > { %v833_v2 = vadd.f32 1.0, %v1414_v63 }
 0x18e   : > { %1415 = vrcp.f32 %v813_v1  ;;  %v825_v10 = vand.u32 2147483648, %v813_v1  ;;  %v823_v14 = vand.u32 2147483647, %v813_v1  ;;  %vm819_vm9 = vweird.f32 %v813_v1 }
 0x18f   : > { %1417 = vrcp.f32 %v833_v2  ;;  %v845_v34 = vand.u32 2147483648, %v833_v2  ;;  %vm839_vm13 = vweird.f32 %v833_v2  ;;  %v843_v16 = vand.u32 2147483647, %v833_v2 }
 0x190   : > { %v826_v21 = vor.u32 1.1754944e-38, %v825_v10  ;;  %vm824_vm11 = vcmp.eq.f32.partialorder %v823_v14, 8.507059e+37 }
 0x191   : > { %v846_v7 = vor.u32 1.1754944e-38, %v845_v34  ;;  %vm844_vm15 = vcmp.eq.f32.partialorder %v843_v16, 8.507059e+37 }
 0x194   : > { %v1416_v3 = vpop.eup %1415 }
 0x195   : > { %v1418_v5 = vpop.eup %1417  ;;  %v815_v6 = vmul.f32 %v1416_v3, %v813_v1  ;;  %vm820_vm8 = vweird.f32 %v1416_v3 }
 0x196   : > { %v835_v9 = vmul.f32 %v1418_v5, %v833_v2  ;;  %vm821_vm10 = vmor %vm819_vm9, %vm820_vm8  ;;  %vm840_vm12 = vweird.f32 %v1418_v5 }
 0x197   : > { %v816_v38 = vsub.f32 1.0, %v815_v6  ;;  %vm841_vm14 = vmor %vm839_vm13, %vm840_vm12 }
 0x198   : > { %v836_v41 = vsub.f32 1.0, %v835_v9 }
 0x199   : > { %v817_v13 = vmul.f32 %v1416_v3, %v816_v38 }
 0x19a   : > { %v837_v15 = vmul.f32 %v1418_v5, %v836_v41 }
 0x19b   : > { %v818_v17 = vadd.f32 %v1416_v3, %v817_v13 }
 0x19c   : > { %v838_v30 = vadd.f32 %v1418_v5, %v837_v15 }
 0x19d   : > { %v822_v23 = vsel %vm821_vm10, %v1416_v3, %v818_v17 }
 0x19e   : > { %v827_v28 = vsel %vm824_vm11, %v826_v21, %v822_v23  ;;  %v842_v44 = vsel %vm841_vm14, %v1418_v5, %v838_v30 }
 0x19f   : > { %v849_v8 = vmul.f32 %v827_v28, %v806_v22  ;;  %v847_v26 = vsel %vm844_vm15, %v846_v7, %v842_v44 }
 0x1a0   : > { %v852_v27 = vsub.f32 1.0, %v847_v26  ;;  %v854_v37 = vmul.f32 %v847_v26, %v1999_v51 }
 0x1a1   : > { %v850_v35 = vadd.f32 %v849_v8, %v487_v31 }
 0x1a3   : > { %1419 = vtanh.f32 %v850_v35 }
 0x1a9   : > { %v1420_v36 = vpop.eup %1419 }
 0x1aa   : > { %v853_v24 = vmul.f32 %v1420_v36, %v852_v27 }
 0x1ac   : > { %v855_v39 = vadd.f32 %v854_v37, %v853_v24 }
 0x1ae   : > { %v860_v40 = vpack.c.bf16 %v855_v39, %v855_v39 }
 0x1b0   : > { %869 = vmatmul.bf16.vlgmr.msra.gmra.mxu1 %v860_v40  ;;  %882 = vmatmul.bf16.vlgmr.msra.gmra.mxu2 %v860_v40 }
 0x1b1   : > { %895 = vmatmul.bf16.vlgmr.msra.gmra.mxu3 %v860_v40 }
 0x22d   : > { %v870_v4 = vpop.f32.mrf.mxu1 }
 0x22e   : > { %v871_v42 = vadd.f32 %v870_v4, %v1969_v58 }
 0x230   : > { %v900_v43 = vadd.f32 %v871_v42, %v1976_v47 }
 0x232   : > { %v1318_v46 = vmul.f32 -1.442695, %v900_v43 }
 0x233   : > { %v883_v48 = vpop.f32.mrf.mxu2 }
 0x234   : > { %1421 = vpow2.f32 %v1318_v46  ;;  %v884_v50 = vadd.f32 %v883_v48, %v1984_v60  ;;  %v896_v52 = vpop.f32.mrf.mxu3 }
 0x235   : > { %v872_v55 = vpop.f32.mrf.mxu1  ;;  %v897_v5 = vadd.f32 %v896_v52, %v1994_v20 }
 0x236   : > { %v920_v56 = vadd.f32 %v884_v50, %v1978_v49 }
 0x238   : > { %v1319_v51 = vmul.f32 -1.442695, %v920_v56 }
 0x23a   : > { %v1422_v59 = vpop.eup %1421  ;;  %1423 = vpow2.f32 %v1319_v51 }
 0x23b   : > { %v904_v33 = vadd.f32 1.0, %v1422_v59  ;;  %v885_v45 = vpop.f32.mrf.mxu2 }
 0x23c   : > { %v898_v54 = vpop.f32.mrf.mxu3 }
 0x23d   : > { %1425 = vrcp.f32 %v904_v33  ;;  %v916_v29 = vand.u32 2147483648, %v904_v33  ;;  %v914_v62 = vand.u32 2147483647, %v904_v33  ;;  %vm910_vm1 = vweird.f32 %v904_v33 }
 0x23f   : > { %v917_v2 = vor.u32 1.1754944e-38, %v916_v29  ;;  %vm915_vm3 = vcmp.eq.f32.partialorder %v914_v62, 8.507059e+37 }
 0x240   : > { %v1424_v0 = vpop.eup %1423 }
 0x241   : > { %v924_v12 = vadd.f32 1.0, %v1424_v0 }
 0x243   : > { %v1426_v61 = vpop.eup %1425  ;;  %1427 = vrcp.f32 %v924_v12  ;;  %v936_v41 = vand.u32 2147483648, %v924_v12  ;;  %v934_v13 = vand.u32 2147483647, %v924_v12  ;;  %vm930_vm5 = vweird.f32 %v924_v12 }
 0x244   : > { %v906_v47 = vmul.f32 %v1426_v61, %v904_v33  ;;  %vm911_vm0 = vweird.f32 %v1426_v61 }
 0x245   : > { %vm912_vm2 = vmor %vm910_vm1, %vm911_vm0  ;;  %v937_v21 = vor.u32 1.1754944e-38, %v936_v41  ;;  %vm935_vm7 = vcmp.eq.f32.partialorder %v934_v13, 8.507059e+37 }
 0x246   : > { %v907_v19 = vsub.f32 1.0, %v906_v47 }
 0x248   : > { %v908_v32 = vmul.f32 %v1426_v61, %v907_v19 }
 0x249   : > { %v1428_v63 = vpop.eup %1427 }
 0x24a   : > { %v926_v1 = vmul.f32 %v1428_v63, %v924_v12  ;;  %v909_v49 = vadd.f32 %v1426_v61, %v908_v32  ;;  %vm931_vm4 = vweird.f32 %v1428_v63 }
 0x24b   : > { %vm932_vm6 = vmor %vm930_vm5, %vm931_vm4 }
 0x24c   : > { %v927_v3 = vsub.f32 1.0, %v926_v1  ;;  %v913_v6 = vsel %vm912_vm2, %v1426_v61, %v909_v49  ;;  %v492_v61 = vadd.f32 %v2011_v25, %v1989_v11 }
 0x24d   : > { %v918_v9 = vsel %vm915_vm3, %v917_v2, %v913_v6 }
 0x24e   : > { %v928_v38 = vmul.f32 %v1428_v63, %v927_v3  ;;  %v940_v10 = vmul.f32 %v918_v9, %v897_v5 }
 0x250   : > { %v941_v14 = vadd.f32 %v940_v10, %v1992_v18  ;;  %v929_v15 = vadd.f32 %v1428_v63, %v928_v38 }
 0x252   : > { %1429 = vtanh.f32 %v941_v14  ;;  %v933_v17 = vsel %vm932_vm6, %v1428_v63, %v929_v15 }
 0x253   : > { %v938_v22 = vsel %vm935_vm7, %v937_v21, %v933_v17 }
 0x254   : > { %v943_v23 = vsub.f32 1.0, %v938_v22  ;;  %v945_v31 = vmul.f32 %v938_v22, %v855_v39 }
 0x258   : > { %v1430_v28 = vpop.eup %1429 }
 0x259   : > { %v944_v30 = vmul.f32 %v1430_v28, %v943_v23 }
 0x25b   : > { %v946_v34 = vadd.f32 %v945_v31, %v944_v30 }
 0x25d   : > { %v951_v8 = vpack.c.bf16 %v946_v34, %v946_v34 }
 0x25f   : > { %960 = vmatmul.bf16.vlgmr.msrb.gmra.mxu0 %v951_v8  ;;  %973 = vmatmul.bf16.vlgmr.msrb.gmra.mxu1 %v951_v8 }
 0x260   : > { %986 = vmatmul.bf16.vlgmr.msrb.gmra.mxu2 %v951_v8 }
 0x2dc   : > { %v961_v16 = vpop.f32.mrf.mxu0  ;;  %v974_v35 = vpop.f32.mrf.mxu1 }
 0x2dd   : > { %v962_v18 = vadd.f32 %v961_v16, %v1969_v58  ;;  %v975_v44 = vadd.f32 %v974_v35, %v1984_v60 }
 0x2df   : > { %v991_v7 = vadd.f32 %v962_v18, %v1980_v53  ;;  %v1011_v26 = vadd.f32 %v975_v44, %v1982_v57 }
 0x2e1   : > { %v1320_v27 = vmul.f32 -1.442695, %v991_v7  ;;  %v1321_v36 = vmul.f32 -1.442695, %v1011_v26 }
 0x2e3   : > { %1431 = vpow2.f32 %v1320_v27  ;;  %v987_v24 = vpop.f32.mrf.mxu2 }
 0x2e4   : > { %1433 = vpow2.f32 %v1321_v36  ;;  %v963_v37 = vpop.f32.mrf.mxu0  ;;  %v976_v39 = vpop.f32.mrf.mxu1  ;;  %v988_v45 = vadd.f32 %v987_v24, %v1994_v20 }
 0x2e9   : > { %v1432_v40 = vpop.eup %1431 }
 0x2ea   : > { %v1434_v4 = vpop.eup %1433  ;;  %v995_v42 = vadd.f32 1.0, %v1432_v40 }
 0x2eb   : > { %v1015_v43 = vadd.f32 1.0, %v1434_v4  ;;  %v989_v46 = vpop.f32.mrf.mxu2 }
 0x2ec   : > { %1435 = vrcp.f32 %v995_v42  ;;  %v1007_v52 = vand.u32 2147483648, %v995_v42  ;;  %v1005_v56 = vand.u32 2147483647, %v995_v42  ;;  %vm1001_vm9 = vweird.f32 %v995_v42 }
 0x2ed   : > { %1437 = vrcp.f32 %v1015_v43  ;;  %v1027_v47 = vand.u32 2147483648, %v1015_v43  ;;  %vm1021_vm13 = vweird.f32 %v1015_v43  ;;  %v1025_v29 = vand.u32 2147483647, %v1015_v43 }
 0x2ee   : > { %v1008_v33 = vor.u32 1.1754944e-38, %v1007_v52  ;;  %vm1006_vm11 = vcmp.eq.f32.partialorder %v1005_v56, 8.507059e+37 }
 0x2ef   : > { %v1028_v63 = vor.u32 1.1754944e-38, %v1027_v47  ;;  %vm1026_vm15 = vcmp.eq.f32.partialorder %v1025_v29, 8.507059e+37 }
 0x2f2   : > { %v1436_v58 = vpop.eup %1435 }
 0x2f3   : > { %v1438_v60 = vpop.eup %1437  ;;  %v997_v48 = vmul.f32 %v1436_v58, %v995_v42  ;;  %vm1002_vm8 = vweird.f32 %v1436_v58 }
 0x2f4   : > { %v1017_v53 = vmul.f32 %v1438_v60, %v1015_v43  ;;  %vm1003_vm10 = vmor %vm1001_vm9, %vm1002_vm8  ;;  %vm1022_vm12 = vweird.f32 %v1438_v60 }
 0x2f5   : > { %v998_v50 = vsub.f32 1.0, %v997_v48  ;;  %vm1023_vm14 = vmor %vm1021_vm13, %vm1022_vm12 }
 0x2f6   : > { %v1018_v57 = vsub.f32 1.0, %v1017_v53 }
 0x2f7   : > { %v999_v55 = vmul.f32 %v1436_v58, %v998_v50 }
 0x2f8   : > { %v1019_v51 = vmul.f32 %v1438_v60, %v1018_v57 }
 0x2f9   : > { %v1000_v59 = vadd.f32 %v1436_v58, %v999_v55 }
 0x2fa   : > { %v1020_v12 = vadd.f32 %v1438_v60, %v1019_v51 }
 0x2fb   : > { %v1004_v54 = vsel %vm1003_vm10, %v1436_v58, %v1000_v59 }
 0x2fc   : > { %v1009_v0 = vsel %vm1006_vm11, %v1008_v33, %v1004_v54  ;;  %v1024_v62 = vsel %vm1023_vm14, %v1438_v60, %v1020_v12 }
 0x2fd   : > { %v1031_v19 = vmul.f32 %v1009_v0, %v988_v45  ;;  %v1029_v1 = vsel %vm1026_vm15, %v1028_v63, %v1024_v62 }
 0x2fe   : > { %v1034_v20 = vsub.f32 1.0, %v1029_v1  ;;  %v1036_v3 = vmul.f32 %v1029_v1, %v946_v34 }
 0x2ff   : > { %v1032_v32 = vadd.f32 %v1031_v19, %v492_v61 }
 0x301   : > { %1439 = vtanh.f32 %v1032_v32 }
 0x307   : > { %v1440_v49 = vpop.eup %1439 }
 0x308   : > { %v1035_v2 = vmul.f32 %v1440_v49, %v1034_v20  ;;  %1042 = sbr.rel (%p1322_p6) target bundleno = 789 (0x315), region = 48 }
 0x30a   : > { %v1037_v5 = vadd.f32 %v1036_v3, %v1035_v2 }
 0x30c   : > { %1038 = vst [vmem:[#allocation3] sm:$0xff] %v1037_v5 }
 0x313   : > { %v1043_v11 = vld [vmem:[#allocation3] sm:$0xff] }
 0x314   : > { %1044 = vst [vmem:[%s2052_s5] sm:$0xff] %v1043_v11 }
 0x315 PF: > { %s15_s20 = sadd.s32 1, %s1463_s20   ;;  %s2053_s18 = smov %s1459_s19 }
 0x316   : > { %p12_p7 = scmp.ge.s32.totalorder %s15_s20, 4   ;;  %s2054_s19 = smov %s2056_s21 }
 0x318   :  { %14 = sbr.rel (!%p12_p7) target bundleno = 2 (0x2), region = 81 }

</bundles_post_ra>
